<compile_context>
chip_gen: v5e
topology: v5e:2x2
jax: 0.10.0
libtpu: 0.0.40
codegen_flags: <defaults>
</compile_context>

<pallas_src>
import functools

import jax
import jax.numpy as jnp
from jax import lax
from jax.experimental import pallas as pl
from jax.experimental.pallas import tpu as pltpu

EPS = 1e-5                       # nn.BatchNorm2d default eps
LANE = 128                       # TPU lane width
VMEM_LIMIT = 32 * 1024 * 1024    # <= physical VMEM on v5e/v6e/v7x


def _round_up(x, m):
    return (x + m - 1) // m * m


# -----------------------------------------------------------------------------
# Kernel 1: per-channel sum / sum-of-squares (global BatchNorm batch stats).
# -----------------------------------------------------------------------------
def _stats_kernel(x_ref, sum_ref, sq_ref):
    @pl.when(pl.program_id(0) == 0)
    def _():
        sum_ref[...] = jnp.zeros_like(sum_ref)
        sq_ref[...] = jnp.zeros_like(sq_ref)

    x = x_ref[...]
    sum_ref[...] += jnp.sum(x, axis=0, keepdims=True)
    sq_ref[...] += jnp.sum(x * x, axis=0, keepdims=True)


def _channel_stats(x2d, tile_rows):
    rows, ch = x2d.shape
    sums, sqs = pl.pallas_call(
        _stats_kernel,
        out_shape=(jax.ShapeDtypeStruct((1, ch), jnp.float32),
                   jax.ShapeDtypeStruct((1, ch), jnp.float32)),
        grid=(rows // tile_rows,),
        in_specs=[pl.BlockSpec((tile_rows, ch), lambda i: (i, 0))],
        out_specs=(pl.BlockSpec((1, ch), lambda i: (0, 0)),
                   pl.BlockSpec((1, ch), lambda i: (0, 0))),
        compiler_params=pltpu.CompilerParams(
            dimension_semantics=("arbitrary",),      # accumulator outputs
            vmem_limit_bytes=VMEM_LIMIT),
    )(x2d)
    mu = sums / rows
    var = sqs / rows - mu * mu                       # biased var (BN training)
    return mu, var


def _bn_scale_shift(mu, var, gamma, beta):
    # Fold training-mode BN into y = x * scale + shift (all float32).
    inv = lax.rsqrt(var + EPS)
    scale = gamma * inv
    shift = beta - mu * scale
    return scale.reshape(1, 1, -1), shift.reshape(1, 1, -1)


# -----------------------------------------------------------------------------
# Fused BN + ReLU + im2col (one bf16 patch per tile, no padded scratch buffer).
# -----------------------------------------------------------------------------
def _bn_relu_im2col(win, scale, shift, *, th, w, h):
    """win: (TH+2, W, C) f32 halo window -> (TH*W, 9*C) bf16 im2col patch."""
    c = win.shape[-1]
    nt = h // th
    t = pl.program_id(0) % nt                        # H-tile index of this program

    y = jnp.maximum(win * scale + shift, 0.0)        # BN + ReLU in f32

    # Zero halo rows that fall outside the image (conv zero padding along H).
    rid = lax.broadcasted_iota(jnp.int32, (th + 2, 1, 1), 0)
    grow = t * th + rid - 1                          # global image row of window row
    y = jnp.where(jnp.logical_and(grow >= 0, grow < h), y, 0.0)

    # Left / right neighbours along W with zero fill (conv zero padding along W).
    zcol = jnp.zeros((th + 2, 1, c), jnp.float32)
    y_l = jnp.concatenate([zcol, y[:, :w - 1, :]], axis=1)   # value at w-1
    y_r = jnp.concatenate([y[:, 1:, :], zcol], axis=1)       # value at w+1

    yb, lb, rb = (v.astype(jnp.bfloat16) for v in (y, y_l, y_r))
    # Tap order must match the (3,3,Cin,Cout) -> (9*Cin,Cout) weight reshape:
    # kh-major, kw in (0,1,2), channel-minor.
    taps = [v[kh:kh + th] for kh in range(3) for v in (lb, yb, rb)]
    patch = jnp.concatenate(taps, axis=-1)                   # (TH, W, 9*C) bf16
    return patch.reshape(th * w, 9 * c)


def _conv1_kernel(win_ref, sc_ref, sh_ref, w_ref, b_ref, o_ref, *, th, w, h):
    patch = _bn_relu_im2col(win_ref[0], sc_ref[...], sh_ref[...], th=th, w=w, h=h)
    acc = jnp.dot(patch, w_ref[...], preferred_element_type=jnp.float32)
    o_ref[...] = acc + b_ref[...]


def _conv2_kernel(win_ref, x_ref, sc_ref, sh_ref, w_ref, b_ref, ws_ref, bs_ref,
                  o_ref, *, th, w, h):
    patch = _bn_relu_im2col(win_ref[0], sc_ref[...], sh_ref[...], th=th, w=w, h=h)
    acc = jnp.dot(patch, w_ref[...], preferred_element_type=jnp.float32)
    # Fused 1x1 shortcut on the ORIGINAL input tile (same f32 accumulator).
    acc += jnp.dot(x_ref[...].astype(jnp.bfloat16), ws_ref[...],
                   preferred_element_type=jnp.float32)
    o_ref[...] = acc + b_ref[...] + bs_ref[...]


# -----------------------------------------------------------------------------
# Wrapper
# -----------------------------------------------------------------------------
def _make_windows(a_nhwc, th):
    """(N, H, W, C) -> (N*H//th, th+2, W, C) overlapping row windows (1-row halo)."""
    n, h, w, c = a_nhwc.shape
    nt = h // th
    a_pad = jnp.pad(a_nhwc, ((0, 0), (1, 1), (0, 0), (0, 0)))
    wins = jnp.stack([a_pad[:, t * th:t * th + th + 2] for t in range(nt)], axis=1)
    return wins.reshape(n * nt, th + 2, w, c)


def residual_block(x_nchw, params, stride=1, tile_h=8):
    # TODO(synk): stride > 1 would need strided im2col row/col selection; the
    # module default (stride=1) is implemented.
    assert stride == 1
    g1, be1, w1, b1, g2, be2, w2, b2, ws, bs = params
    n, cin, h, w = x_nchw.shape
    cout = w1.shape[0]
    cip = _round_up(cin, LANE)               # lane-dense channel padding
    cop = _round_up(cout, LANE)

    th = tile_h if h % tile_h == 0 else h
    nt = h // th
    rows = n * h * w
    tile_rows = th * w
    grid = (n * nt,)

    # ---- layout prep (cheap wrapper-side XLA ops) ---------------------------
    x = jnp.transpose(x_nchw, (0, 2, 3, 1)).astype(jnp.float32)      # NHWC
    x = jnp.pad(x, ((0, 0), (0, 0), (0, 0), (0, cip - cin)))
    x2d = x.reshape(rows, cip)
    x_win = _make_windows(x, th)

    def pad_c(v, c_to):
        return jnp.pad(v.astype(jnp.float32), (0, c_to - v.shape[0]))

    def prep_w3x3(wt, ci, co, ci_p, co_p):
        # OIHW -> HWIO -> zero-pad channels -> (9*Ci_p, Co_p) bf16
        hwio = jnp.transpose(wt, (2, 3, 1, 0)).astype(jnp.float32)
        hwio = jnp.pad(hwio, ((0, 0), (0, 0), (0, ci_p - ci), (0, co_p - co)))
        return hwio.reshape(9 * ci_p, co_p).astype(jnp.bfloat16)

    w1m = prep_w3x3(w1, cin, cout, cip, cop)
    w2m = prep_w3x3(w2, cout, cout, cop, cop)
    wsm = jnp.pad(jnp.transpose(ws[:, :, 0, 0], (1, 0)).astype(jnp.float32),
                  ((0, cip - cin), (0, cop - cout))).astype(jnp.bfloat16)
    b1v = pad_c(b1, cop).reshape(1, cop)
    b2v = pad_c(b2, cop).reshape(1, cop)
    bsv = pad_c(bs, cop).reshape(1, cop)

    # ---- BN1 statistics (global, tiled reduction) ---------------------------
    mu1, var1 = _channel_stats(x2d, tile_rows)
    sc1, sh1 = _bn_scale_shift(mu1, var1,
                               pad_c(g1, cip).reshape(1, cip),
                               pad_c(be1, cip).reshape(1, cip))

    conv_params = pltpu.CompilerParams(dimension_semantics=("parallel",),
                                       vmem_limit_bytes=VMEM_LIMIT)
    win_spec_i = pl.BlockSpec((1, th + 2, w, cip), lambda i: (i, 0, 0, 0))
    win_spec_o = pl.BlockSpec((1, th + 2, w, cop), lambda i: (i, 0, 0, 0))
    row_spec_i = pl.BlockSpec((tile_rows, cip), lambda i: (i, 0))
    row_spec_o = pl.BlockSpec((tile_rows, cop), lambda i: (i, 0))

    def full(shape):
        return pl.BlockSpec(shape, lambda i: (0,) * len(shape))

    # ---- h1 = conv3x3(ReLU(BN1(x)))  (one im2col MXU dot per tile) ----------
    h1_2d = pl.pallas_call(
        functools.partial(_conv1_kernel, th=th, w=w, h=h),
        out_shape=jax.ShapeDtypeStruct((rows, cop), jnp.float32),
        grid=grid,
        in_specs=[win_spec_i,
                  full((1, 1, cip)), full((1, 1, cip)),
                  full((9 * cip, cop)), full((1, cop))],
        out_specs=row_spec_o,
        compiler_params=conv_params,
    )(x_win, sc1, sh1, w1m, b1v)

    # ---- BN2 statistics on h1 ------------------------------------------------
    mu2, var2 = _channel_stats(h1_2d, tile_rows)
    sc2, sh2 = _bn_scale_shift(mu2, var2,
                               pad_c(g2, cop).reshape(1, cop),
                               pad_c(be2, cop).reshape(1, cop))

    h1_win = _make_windows(h1_2d.reshape(n, h, w, cop), th)

    # ---- out = conv3x3(ReLU(BN2(h1))) + conv1x1(x)  (shortcut fused) --------
    out2d = pl.pallas_call(
        functools.partial(_conv2_kernel, th=th, w=w, h=h),
        out_shape=jax.ShapeDtypeStruct((rows, cop), jnp.float32),
        grid=grid,
        in_specs=[win_spec_o, row_spec_i,
                  full((1, 1, cop)), full((1, 1, cop)),
                  full((9 * cop, cop)), full((1, cop)),
                  full((cip, cop)), full((1, cop))],
        out_specs=row_spec_o,
        compiler_params=conv_params,
    )(h1_win, x2d, sc2, sh2, w2m, b2v, wsm, bsv)

    out = out2d.reshape(n, h, w, cop)[:, :, :, :cout]
    return jnp.transpose(out, (0, 3, 1, 2))                          # NCHW


# -----------------------------------------------------------------------------
# Pure-JAX reference (NCHW, XLA convs) for correctness checking.
# -----------------------------------------------------------------------------
def reference(x, params):
    g1, be1, w1, b1, g2, be2, w2, b2, ws, bs = params

    def bn_relu(x, g, b):
        mu = jnp.mean(x, axis=(0, 2, 3), keepdims=True)
        var = jnp.mean((x - mu) ** 2, axis=(0, 2, 3), keepdims=True)
        y = (x - mu) / jnp.sqrt(var + EPS) * g.reshape(1, -1, 1, 1) + b.reshape(1, -1, 1, 1)
        return jnp.maximum(y, 0.0)

    dn = ('NCHW', 'OIHW', 'NCHW')

    def conv(x, wt, b, pad):
        y = lax.conv_general_dilated(x, wt, (1, 1), [(pad, pad), (pad, pad)],
                                     dimension_numbers=dn)
        return y + b.reshape(1, -1, 1, 1)

    y = bn_relu(x, g1, be1)
    y = conv(y, w1, b1, 1)
    y = bn_relu(y, g2, be2)
    y = conv(y, w2, b2, 1)
    sc = conv(x, ws, bs, 0)
    return y + sc


if __name__ == "__main__":
    N, Cin, Cout, H, W = 2, 4, 8, 16, 16
    key = jax.random.PRNGKey(0)
    ks = jax.random.split(key, 11)

    x = jax.random.normal(ks[0], (N, Cin, H, W), jnp.float32)

    g1 = 1.0 + 0.1 * jax.random.normal(ks[1], (Cin,), jnp.float32)    # bn1 weight
    be1 = 0.1 * jax.random.normal(ks[2], (Cin,), jnp.float32)         # bn1 bias
    w1 = 0.1 * jax.random.normal(ks[3], (Cout, Cin, 3, 3), jnp.float32)
    b1 = 0.1 * jax.random.normal(ks[4], (Cout,), jnp.float32)
    g2 = 1.0 + 0.1 * jax.random.normal(ks[5], (Cout,), jnp.float32)   # bn2 weight
    be2 = 0.1 * jax.random.normal(ks[6], (Cout,), jnp.float32)        # bn2 bias
    w2 = 0.1 * jax.random.normal(ks[7], (Cout, Cout, 3, 3), jnp.float32)
    b2 = 0.1 * jax.random.normal(ks[8], (Cout,), jnp.float32)
    ws = 0.1 * jax.random.normal(ks[9], (Cout, Cin, 1, 1), jnp.float32)
    bs = 0.1 * jax.random.normal(ks[10], (Cout,), jnp.float32)

    params = (g1, be1, w1, b1, g2, be2, w2, b2, ws, bs)

    out = jax.block_until_ready(residual_block(x, params))
    ref = jax.block_until_ready(reference(x, params))

    assert out.shape == (N, Cout, H, W), out.shape
    err = float(jnp.max(jnp.abs(out - ref)))
    assert jnp.allclose(out, ref, rtol=2e-2, atol=2e-2), err

    print("KERNEL_OK")
</pallas_src>

<mosaic_0001>
module attributes {stable_mosaic.version = 11 : i64} {
  func.func @_stats_kernel(%arg0: i32, %arg1: memref<128x128xf32, #tpu.memory_space<vmem>>, %arg2: memref<1x128xf32, #tpu.memory_space<vmem>>, %arg3: memref<1x128xf32, #tpu.memory_space<vmem>>) attributes {dimension_semantics = [#tpu.dimension_semantics<arbitrary>], iteration_bounds = array<i64: 4>, scalar_prefetch = 0 : i64, scratch_operands = 0 : i64, tpu.core_type = #tpu.core_type<tc>, window_params = [{transform_indices = @transform_0, window_bounds = array<i64: 128, 128>}, {pipeline_mode = #tpu.pipeline_mode<synchronous>, transform_indices = @transform_1, window_bounds = array<i64: 1, 128>}, {pipeline_mode = #tpu.pipeline_mode<synchronous>, transform_indices = @transform_2, window_bounds = array<i64: 1, 128>}]} {
    %c0_i32 = arith.constant 0 : i32
    %0 = arith.cmpi eq, %arg0, %c0_i32 : i32
    %1 = arith.extui %0 : i1 to i32
    %c0_i32_0 = arith.constant 0 : i32
    %2 = arith.cmpi ne, %1, %c0_i32_0 : i32
    scf.if %2 {
      %cst_11 = arith.constant 0.000000e+00 : f32
      %15 = vector.broadcast %cst_11 : f32 to vector<1x128xf32>
      %c0_12 = arith.constant 0 : index
      %c0_13 = arith.constant 0 : index
      %16 = vector.load %arg2[%c0_12, %c0_13] : memref<1x128xf32, #tpu.memory_space<vmem>>, vector<1x128xf32>
      tpu.vector_store %arg2[%c0_12, %c0_13], %15 {strides = array<i32>} : memref<1x128xf32, #tpu.memory_space<vmem>>, vector<1x128xf32>,
      %cst_14 = arith.constant 0.000000e+00 : f32
      %17 = vector.broadcast %cst_14 : f32 to vector<1x128xf32>
      %c0_15 = arith.constant 0 : index
      %c0_16 = arith.constant 0 : index
      %18 = vector.load %arg3[%c0_15, %c0_16] : memref<1x128xf32, #tpu.memory_space<vmem>>, vector<1x128xf32>
      tpu.vector_store %arg3[%c0_15, %c0_16], %17 {strides = array<i32>} : memref<1x128xf32, #tpu.memory_space<vmem>>, vector<1x128xf32>,
    } else {
    }
    %c0 = arith.constant 0 : index
    %c0_1 = arith.constant 0 : index
    %3 = vector.load %arg1[%c0, %c0_1] : memref<128x128xf32, #tpu.memory_space<vmem>>, vector<128x128xf32>
    %c0_2 = arith.constant 0 : index
    %c0_3 = arith.constant 0 : index
    %4 = vector.load %arg2[%c0_2, %c0_3] : memref<1x128xf32, #tpu.memory_space<vmem>>, vector<1x128xf32>
    %cst = arith.constant dense<0.000000e+00> : vector<128xf32>
    %5 = vector.multi_reduction <add>, %3, %cst [0] : vector<128x128xf32> to vector<128xf32>
    %6 = vector.shape_cast %5 : vector<128xf32> to vector<1x128xf32>
    %7 = arith.addf %4, %6 : vector<1x128xf32>
    %c0_4 = arith.constant 0 : index
    %c0_5 = arith.constant 0 : index
    %8 = vector.load %arg2[%c0_4, %c0_5] : memref<1x128xf32, #tpu.memory_space<vmem>>, vector<1x128xf32>
    tpu.vector_store %arg2[%c0_4, %c0_5], %7 {strides = array<i32>} : memref<1x128xf32, #tpu.memory_space<vmem>>, vector<1x128xf32>,
    %c0_6 = arith.constant 0 : index
    %c0_7 = arith.constant 0 : index
    %9 = vector.load %arg3[%c0_6, %c0_7] : memref<1x128xf32, #tpu.memory_space<vmem>>, vector<1x128xf32>
    %10 = arith.mulf %3, %3 : vector<128x128xf32>
    %cst_8 = arith.constant dense<0.000000e+00> : vector<128xf32>
    %11 = vector.multi_reduction <add>, %10, %cst_8 [0] : vector<128x128xf32> to vector<128xf32>
    %12 = vector.shape_cast %11 : vector<128xf32> to vector<1x128xf32>
    %13 = arith.addf %9, %12 : vector<1x128xf32>
    %c0_9 = arith.constant 0 : index
    %c0_10 = arith.constant 0 : index
    %14 = vector.load %arg3[%c0_9, %c0_10] : memref<1x128xf32, #tpu.memory_space<vmem>>, vector<1x128xf32>
    tpu.vector_store %arg3[%c0_9, %c0_10], %13 {strides = array<i32>} : memref<1x128xf32, #tpu.memory_space<vmem>>, vector<1x128xf32>,
    return
  }
  func.func @transform_0(%arg0: i32) -> (i32, i32) {
    %c0_i32 = arith.constant 0 : i32
    %c0_i32_0 = arith.constant 0 : i32
    return %arg0, %c0_i32 : i32, i32
  }
  func.func @transform_1(%arg0: i32) -> (i32, i32) {
    %c0_i32 = arith.constant 0 : i32
    %c0_i32_0 = arith.constant 0 : i32
    %c0_i32_1 = arith.constant 0 : i32
    return %c0_i32, %c0_i32_0 : i32, i32
  }
  func.func @transform_2(%arg0: i32) -> (i32, i32) {
    %c0_i32 = arith.constant 0 : i32
    %c0_i32_0 = arith.constant 0 : i32
    %c0_i32_1 = arith.constant 0 : i32
    return %c0_i32, %c0_i32_0 : i32, i32
  }
}

</mosaic_0001>

<bundles_post_ra>
// kernel: tpu_custom_call.1
= control target key start
LH: loop header
LB: loop body
LE: loop exit
PB: predicated region body
PF: predicated region fallthrough
CT: control target
= control target key end

     0   :  { %8 = vsyncpa [#allocation3], 0  ;;  %s668_s0 = inlined_call_operand.hbm [shape: f32[512,128], index: 0, kind: input, shape index: {}]   ;;  %s669_s1 = inlined_call_operand.hbm [shape: f32[1,128], index: 1, kind: output, shape index: {0}]   ;;  %s670_s2 = inlined_call_operand.hbm [shape: f32[1,128], index: 2, kind: output, shape index: {1}]  }
   0x1   :  { %10 = vsyncpa [#allocation3 + $0x1], 0 }
   0x2   :  { %11 = vsyncpa [#allocation4], 0 }
   0x3   :  { %12 = vsyncpa [#allocation7], 0  ;;  %s543_s9 = smov 0   ;;  %s545_s10 = smov 0  }
   0x4   :  { %s547_s11 = smov 0   ;;  %s549_s12 = smov 0  }
   0x5 LB: > { %s562_s13 = sadd.s32 4294967295, %s521_s12   ;;  %s565_s14 = sadd.s32 1, %s521_s12   ;;  %s521_s12 = sphi %s549_s12, %s677_s12   ;;  %s517_s11 = sphi %s547_s11, %s676_s11   ;;  %s513_s10 = sphi %s545_s10, %s675_s10   ;;  %s509_s9 = sphi %s543_s9, %s674_s9  }
   0x6   : > { %s22_s15 = ssub.s32 %s521_s12, %s565_s14  ;;  %s25_s16 = sadd.s32 1, %s517_s11 }
   0x7   : > { %p23_p0 = scmp.eq.s32.totalorder %s22_s15, 0  ;;  %p32_p1 = scmp.ne.s32.totalorder %s517_s11, %s513_s10 }
   0x8   : > { %p33_p2 = scmp.eq.s32.totalorder %s521_s12, 0  ;;  %p38_p3 = scmp.ne.s32.totalorder %s513_s10, %s509_s9 }
   0x9   : > { %s575_s17 = scalar_select %p23_p0, %s517_s11, %s25_s16  }
   0xa   : > { %p577_p4 = por %p33_p2, %p32_p1  ;;  %p39_p5 = scmp.eq.s32.totalorder %s562_s13, 0 }
   0xb   : > { %p351_p6 = scmp.lt.s32.totalorder %s521_s12, 4  ;;  %s104_s20 = sand.u32 1, %s517_s11  }
   0xc   : > { %p583_p7 = por %p39_p5, %p38_p3  ;;  %s324_s21 = sshll.u32 %s104_s20, 7 }
   0xd   : > { %s336_s22 = sshll.u32 %s521_s12, 7  ;;  %s108_s26 = scalar_lea.vmem [#allocation2], %s324_s21 }
   0xe   : > { %s113_s25 = scalar_lea.hbm %s668_s0, %s336_s22  ;;  %s116_s27 = sshll.u32 %s108_s26, 4  ;;  %s117_s27 = int_to_ptr.vmem [resolvable:$true] %s116_s27 }
   0xf   : > { %s114_s28 = sshll.u32 %s113_s25, 4  ;;  %p594_p8 = pnand %p351_p6, %p577_p4  ;;  %s115_s28 = int_to_ptr.hbm [resolvable:$true] %s114_s28 }
  0x10   : > { %p327_p9 = scmp.ge.s32.totalorder %s521_s12, 1  ;;  %s105_s30 = scalar_lea.sflag [#allocation3], %s104_s20 }
  0x11   : > { %s393_s3 = sshra.s32 %s115_s28, 4  ;;  %p397_p11 = pneg %p594_p8  ;;  %s394_s3 = int_to_ptr.hbm [resolvable:$true] %s393_s3 }
  0x12   : > { %s395_s4 = scalar_lea.hbm %s394_s3, 128  ;;  %s400_s7 = scalar_lea.hbm %s668_s0, 512 }
  0x13   : > { %p396_p10 = scmp.ne.s32.totalorder %s394_s3, %s395_s4  ;;  %p401_p0 = scmp.lt.s32.totalorder %s394_s3, %s668_s0 }
  0x14   : > { %p402_p1 = scmp.lt.s32.totalorder %s400_s7, %s395_s4 }
  0x15   : > { %p398_p12 = pnand %p397_p11, %p396_p10 }
  0x16   : > { %p403_p2 = por %p402_p1, %p401_p0 }
  0x17   : > { %p399_p13 = pneg %p398_p12 }
  0x19   : > { %p404_p3 = pnand %p403_p2, %p399_p13 }
  0x1b   : > { %407 = shalt.err (!%p404_p3)
}
  0x1c   : > { %s523_s15 = smov 128   ;;  %s524_s16 = smov 8  }
  0x1d   : > { %350 = dma.hbm_to_vmem [thread:$0]  (!%p594_p8), %s115_s28, 2048, %s117_s27, %s105_s30, %s523_s15, %s523_s15, %s524_s16  }
  0x1e   : > { %p124_p4 = scmp.lt.s32.totalorder %s521_s12, 5 }
  0x20   : > { %p125_p5 = pnand %p327_p9, %p124_p4 }
  0x21   : > { %s130_s18 = sand.u32 (!%p125_p5), 1, %s513_s10  }
  0x22   : > { %128 = sbr.rel (%p125_p5) target bundleno = 103 (0x67), region = 24  ;;  %s328_s20 = sshll.u32 (!%p125_p5), %s130_s18, 7 }
  0x23   : > { %s131_s21 = scalar_lea.sflag (!%p125_p5), [#allocation3], %s130_s18  ;;  %s613_s22 = scalar_lea.vmem (!%p125_p5), [#allocation2], %s328_s20 }
  0x27   : > { %496 = dma.done.wait (%p583_p7), %s131_s21, 2048  }
  0x28   : > { %498 = vsyncadd (%p583_p7), %s131_s21, 4294965248  ;;  %p329_p6 = scmp.ne.s32.totalorder %s562_s13, 0 }
  0x2a   : > { %155 = sbr.rel (%p329_p6) target bundleno = 50 (0x32), region = 32 }
  0x2f   : > { %v525_v0 = vmov 0.0  }
  0x30   : > { %156 = vst [vmem:[#allocation5] sm:$0x1] %v525_v0 }
  0x31   : > { %157 = vst [vmem:[#allocation6] sm:$0x1] %v525_v0 }
  0x32 PF: > { %v158_v1 = vld [vmem:[%s613_s22] sm:$0xff]  ;;  %v159_v2 = vld [vmem:[%s613_s22 + $0x8] sm:$0xff]  ;;  %v160_v3 = vld [vmem:[%s613_s22 + $0x10] sm:$0xff]  ;;  %s526_s12 = smov [#allocation5]   ;;  %s246_s25 = sshll.u32 %s669_s1, 4  ;;  %s247_s25 = int_to_ptr.hbm [resolvable:$true] %s246_s25 }
  0x33   : > { %v161_v4 = vld [vmem:[%s613_s22 + $0x18] sm:$0xff]  ;;  %v175_v5 = vadd.f32 %v159_v2, %v158_v1  ;;  %v199_v6 = vmul.f32 %v158_v1, %v158_v1  ;;  %v200_v7 = vmul.f32 %v159_v2, %v159_v2  ;;  %v201_v8 = vmul.f32 %v160_v3, %v160_v3  ;;  %v162_v9 = vld [vmem:[%s613_s22 + $0x20] sm:$0xff]  ;;  %v163_v13 = vld [vmem:[%s613_s22 + $0x28] sm:$0xff]  ;;  %s244_s19 = sshll.u32 %s526_s12, 4  ;;  %p352_p7 = scmp.eq.s32.totalorder %s562_s13, 3  ;;  %s245_s19 = int_to_ptr.vmem [resolvable:$true] %s244_s19 }
  0x34   : > { %v202_v11 = vmul.f32 %v161_v4, %v161_v4  ;;  %v203_v15 = vmul.f32 %v162_v9, %v162_v9  ;;  %v164_v17 = vld [vmem:[%s613_s22 + $0x30] sm:$0xff]  ;;  %v204_v19 = vmul.f32 %v163_v13, %v163_v13  ;;  %v165_v21 = vld [vmem:[%s613_s22 + $0x38] sm:$0xff]  ;;  %v166_v25 = vld [vmem:[%s613_s22 + $0x40] sm:$0xff]  ;;  %s527_s26 = smov [#allocation6]   ;;  %s258_s30 = sshll.u32 %s670_s2, 4  ;;  %s259_s30 = int_to_ptr.hbm [resolvable:$true] %s258_s30 }
  0x35   : > { %v176_v10 = vadd.f32 %v175_v5, %v160_v3  ;;  %v215_v12 = vadd.f32 %v200_v7, %v199_v6  ;;  %v205_v23 = vmul.f32 %v164_v17, %v164_v17  ;;  %v206_v27 = vmul.f32 %v165_v21, %v165_v21  ;;  %v167_v29 = vld [vmem:[%s613_s22 + $0x48] sm:$0xff]  ;;  %v168_v33 = vld [vmem:[%s613_s22 + $0x50] sm:$0xff]  ;;  %v169_v37 = vld [vmem:[%s613_s22 + $0x58] sm:$0xff]  ;;  %s256_s27 = sshll.u32 %s527_s26, 4  ;;  %s257_s27 = int_to_ptr.vmem [resolvable:$true] %s256_s27 }
  0x36   : > { %v207_v31 = vmul.f32 %v166_v25, %v166_v25  ;;  %v208_v35 = vmul.f32 %v167_v29, %v167_v29  ;;  %v209_v39 = vmul.f32 %v168_v33, %v168_v33  ;;  %v170_v41 = vld [vmem:[%s613_s22 + $0x60] sm:$0xff]  ;;  %v210_v43 = vmul.f32 %v169_v37, %v169_v37  ;;  %v171_v45 = vld [vmem:[%s613_s22 + $0x68] sm:$0xff]  ;;  %v172_v49 = vld [vmem:[%s613_s22 + $0x70] sm:$0xff] }
  0x37   : > { %v177_v14 = vadd.f32 %v176_v10, %v161_v4  ;;  %v216_v16 = vadd.f32 %v215_v12, %v201_v8  ;;  %v211_v47 = vmul.f32 %v170_v41, %v170_v41  ;;  %v212_v51 = vmul.f32 %v171_v45, %v171_v45  ;;  %v173_v53 = vld [vmem:[%s613_s22 + $0x78] sm:$0xff]  ;;  %v174_v7 = vld [vmem:[#allocation5] sm:$0x1] }
  0x38   : > { %v213_v55 = vmul.f32 %v172_v49, %v172_v49  ;;  %v214_v58 = vmul.f32 %v173_v53, %v173_v53  ;;  %v198_v12 = vld [vmem:[#allocation6] sm:$0x1] }
  0x39   : > { %v178_v18 = vadd.f32 %v177_v14, %v162_v9  ;;  %v217_v20 = vadd.f32 %v216_v16, %v202_v11 }
  0x3b   : > { %v179_v22 = vadd.f32 %v178_v18, %v163_v13  ;;  %v218_v24 = vadd.f32 %v217_v20, %v203_v15 }
  0x3d   : > { %v180_v26 = vadd.f32 %v179_v22, %v164_v17  ;;  %v219_v28 = vadd.f32 %v218_v24, %v204_v19 }
  0x3f   : > { %v181_v30 = vadd.f32 %v180_v26, %v165_v21  ;;  %v220_v32 = vadd.f32 %v219_v28, %v205_v23 }
  0x41   : > { %v182_v34 = vadd.f32 %v181_v30, %v166_v25  ;;  %v221_v36 = vadd.f32 %v220_v32, %v206_v27 }
  0x43   : > { %v183_v38 = vadd.f32 %v182_v34, %v167_v29  ;;  %v222_v40 = vadd.f32 %v221_v36, %v207_v31 }
  0x45   : > { %v184_v42 = vadd.f32 %v183_v38, %v168_v33  ;;  %v223_v44 = vadd.f32 %v222_v40, %v208_v35 }
  0x47   : > { %v185_v46 = vadd.f32 %v184_v42, %v169_v37  ;;  %v224_v48 = vadd.f32 %v223_v44, %v209_v39 }
  0x49   : > { %v186_v50 = vadd.f32 %v185_v46, %v170_v41  ;;  %v225_v52 = vadd.f32 %v224_v48, %v210_v43 }
  0x4b   : > { %v187_v54 = vadd.f32 %v186_v50, %v171_v45  ;;  %v226_v56 = vadd.f32 %v225_v52, %v211_v47 }
  0x4d   : > { %v188_v57 = vadd.f32 %v187_v54, %v172_v49  ;;  %v227_v59 = vadd.f32 %v226_v56, %v212_v51 }
  0x4f   : > { %v189_v60 = vadd.f32 %v188_v57, %v173_v53  ;;  %v228_v61 = vadd.f32 %v227_v59, %v213_v55 }
  0x51   : > { %v190_v62 = vrot.slane %v189_v60, 4  ;;  %v229_v63 = vadd.f32 %v228_v61, %v214_v58 }
  0x53   : > { %v191_v0 = vadd.f32 %v190_v62, %v189_v60  ;;  %v230_v1 = vrot.slane %v229_v63, 4 }
  0x55   : > { %v192_v2 = vrot.slane %v191_v0, 2  ;;  %v231_v3 = vadd.f32 %v230_v1, %v229_v63 }
  0x57   : > { %v193_v4 = vadd.f32 %v192_v2, %v191_v0  ;;  %v232_v5 = vrot.slane %v231_v3, 2 }
  0x59   : > { %v194_v6 = vrot.slane %v193_v4, 1  ;;  %v233_v8 = vadd.f32 %v232_v5, %v231_v3 }
  0x5b   : > { %v195_v9 = vadd.f32 %v194_v6, %v193_v4  ;;  %v234_v10 = vrot.slane %v233_v8, 1 }
  0x5d   : > { %v196_v11 = vadd.f32 %v195_v9, %v174_v7  ;;  %v235_v13 = vadd.f32 %v234_v10, %v233_v8 }
  0x5f   : > { %197 = vst [vmem:[#allocation5] sm:$0x1] %v196_v11  ;;  %v236_v14 = vadd.f32 %v235_v13, %v198_v12 }
  0x60   : > { %340 = dma.vmem_to_hbm [thread:$0]  (%p352_p7), %s245_s19, 16, %s247_s25, [#allocation4]  }
  0x61   : > { %237 = vst [vmem:[#allocation6] sm:$0x1] %v236_v14 }
  0x62   : > { %342 = dma.vmem_to_hbm [thread:$0]  (%p352_p7), %s257_s27, 16, %s259_s30, [#allocation7]  }
  0x63   : > { %500 = dma.done.wait (%p352_p7), [#allocation4], 16  }
  0x64   : > { %502 = vsyncadd (%p352_p7), [#allocation4], 4294967280 }
  0x65   : > { %504 = dma.done.wait (%p352_p7), [#allocation7], 16  }
  0x66   : > { %506 = vsyncadd (%p352_p7), [#allocation7], 4294967280 }
  0x67 PF: > { %p15_p8 = scmp.ge.s32.totalorder %s565_s14, 6   ;;  %s674_s9 = smov %s513_s10 }
  0x68   : > { %s675_s10 = smov %s517_s11  ;;  %s676_s11 = smov %s575_s17 }
  0x69   : > { %s677_s12 = smov %s565_s14  ;;  %17 = sbr.rel (!%p15_p8) target bundleno = 5 (0x5), region = 73 }
  0x6e   :  { %277 = vsyncpa [#allocation3], 1 }
  0x6f   :  { %279 = vsyncpa [#allocation3 + $0x1], 1 }
  0x70   :  { %280 = vsyncpa [#allocation4], 1 }
  0x71   :  { %282 = vsyncpa [#allocation4 + $0x1], 1 }
  0x72   :  { %283 = vsyncpa [#allocation7], 1 }

</bundles_post_ra>
